<compile_context>
chip_gen: v7x
topology: tpu7x:2x2x1
jax: 0.10.0
libtpu: 0.0.40
codegen_flags: <defaults>
</compile_context>

<pallas_src>
import functools

import jax
import jax.numpy as jnp
from jax import lax
from jax.experimental import pallas as pl
from jax.experimental.pallas import tpu as pltpu

D_IN, H1, H2, H3, D_OUT = 6, 60, 60, 30, 3


def _mlp_kernel(x_ref,
                w1_ref, b1_ref,
                w2_ref, b2_ref,
                w3_ref, b3_ref,
                w4_ref, b4_ref,
                o_ref,
                *, chunk, n_chunks):
    # Load the (tiny) weights once per grid step; they stay in vregs/VMEM.
    w1 = w1_ref[...]; b1 = b1_ref[...]
    w2 = w2_ref[...]; b2 = b2_ref[...]
    w3 = w3_ref[...]; b3 = b3_ref[...]
    w4 = w4_ref[...]; b4 = b4_ref[...]

    def body(c, carry):
        start = pl.multiple_of(c * chunk, chunk)
        xc = x_ref[:, pl.ds(start, chunk)].astype(jnp.float32)   # (6, chunk)

        h = jnp.dot(w1, xc, preferred_element_type=jnp.float32) + b1   # (60, chunk)
        h = jnp.maximum(h, 0.0)
        h = jnp.dot(w2, h, preferred_element_type=jnp.float32) + b2    # (60, chunk)
        h = jnp.maximum(h, 0.0)
        h = jnp.dot(w3, h, preferred_element_type=jnp.float32) + b3    # (30, chunk)
        h = jnp.maximum(h, 0.0)
        z = jnp.dot(w4, h, preferred_element_type=jnp.float32) + b4    # (3, chunk)

        # 2 * sigmoid(z); lane-dense store (chunk is a multiple of 128).
        o_ref[:, pl.ds(start, chunk)] = (2.0 * jax.nn.sigmoid(z)).astype(o_ref.dtype)
        return carry

    lax.fori_loop(0, n_chunks, body, 0, unroll=True)


@functools.partial(jax.jit, static_argnames=("tb",))
def neural_net_forward(x, params, *, tb=2048):
    """x: (B, 6) float32 (PyTorch layout).  Returns (B, 3) float32."""
    B = x.shape[0]
    lane = 128

    # Effective lane tile: multiple of 128, at most `tb`, shrunk for tiny batches.
    tb_eff = max(lane, min(tb, ((B + lane - 1) // lane) * lane))
    Bp = ((B + tb_eff - 1) // tb_eff) * tb_eff
    num_steps = Bp // tb_eff  # NOTE: for large B this is >=2 so both v7x TCs get work.

    # Inner chunk (bounds vreg live ranges of the (60, chunk) intermediates).
    chunk = 512 if tb_eff % 512 == 0 else (256 if tb_eff % 256 == 0 else 128)
    n_chunks = tb_eff // chunk

    # Transpose to feature-major (layout plumbing only) and pad the batch axis.
    xt = x.T  # (D_IN, B)
    if Bp != B:
        xt = jnp.pad(xt, ((0, 0), (0, Bp - B)))

    w1, b1 = params["w1"], params["b1"]
    w2, b2 = params["w2"], params["b2"]
    w3, b3 = params["w3"], params["b3"]
    w4, b4 = params["w4"], params["b4"]

    full = lambda arr: pl.BlockSpec(arr.shape, lambda i: (0, 0))

    kernel = functools.partial(_mlp_kernel, chunk=chunk, n_chunks=n_chunks)

    out_t = pl.pallas_call(
        kernel,
        out_shape=jax.ShapeDtypeStruct((D_OUT, Bp), jnp.float32),
        grid_spec=pltpu.PrefetchScalarGridSpec(
            num_scalar_prefetch=0,
            grid=(num_steps,),
            in_specs=[
                pl.BlockSpec((D_IN, tb_eff), lambda i: (0, i)),   # x tile (6, tb_eff)
                full(w1), full(b1),
                full(w2), full(b2),
                full(w3), full(b3),
                full(w4), full(b4),
            ],
            out_specs=pl.BlockSpec((D_OUT, tb_eff), lambda i: (0, i)),
        ),
        compiler_params=pltpu.CompilerParams(
            dimension_semantics=("parallel",),
            vmem_limit_bytes=32 * 1024 * 1024,  # safe on v5e/v6e/v7x scoped limits
        ),
    )(xt, w1, b1, w2, b2, w3, b3, w4, b4)

    return out_t[:, :B].T  # back to (B, 3)


def init_params(key):
    """Deterministic init mimicking PyTorch nn.Linear (uniform +-1/sqrt(fan_in)).

    Weights are stored PyTorch-style (out_features, in_features); biases (out, 1)."""
    dims = [(D_IN, H1), (H1, H2), (H2, H3), (H3, D_OUT)]
    params = {}
    keys = jax.random.split(key, 2 * len(dims))
    for idx, (fan_in, fan_out) in enumerate(dims):
        bound = 1.0 / jnp.sqrt(jnp.float32(fan_in))
        wk, bk = keys[2 * idx], keys[2 * idx + 1]
        params[f"w{idx + 1}"] = jax.random.uniform(
            wk, (fan_out, fan_in), jnp.float32, -bound, bound)
        params[f"b{idx + 1}"] = jax.random.uniform(
            bk, (fan_out, 1), jnp.float32, -bound, bound)
    return params


def _reference(x, params):
    h = x
    for i in range(1, 4):
        h = jnp.maximum(h @ params[f"w{i}"].T + params[f"b{i}"].T, 0.0)
    z = h @ params["w4"].T + params["b4"].T
    return 2.0 * jax.nn.sigmoid(z)


if __name__ == "__main__":
    key = jax.random.PRNGKey(0)
    pkey, xkey = jax.random.split(key)

    params = init_params(pkey)
    # Small example batch; deliberately NOT a multiple of 128 to exercise the
    # pad-and-slice path in the wrapper.
    B = 200
    x = jax.random.normal(xkey, (B, D_IN), jnp.float32)

    out = neural_net_forward(x, params)
    out = jax.block_until_ready(out)

    ref = _reference(x, params)
    assert out.shape == (B, D_OUT)
    assert jnp.allclose(out, ref, atol=1e-5, rtol=1e-5), "mismatch vs JAX reference"

    print("KERNEL_OK")
</pallas_src>

<mosaic_0001>
module attributes {stable_mosaic.version = 11 : i64} {
  func.func @_mlp_kernel(%arg0: i32, %arg1: memref<6x256xf32, #tpu.memory_space<vmem>>, %arg2: memref<60x6xf32, #tpu.memory_space<vmem>>, %arg3: memref<60x1xf32, #tpu.memory_space<vmem>>, %arg4: memref<60x60xf32, #tpu.memory_space<vmem>>, %arg5: memref<60x1xf32, #tpu.memory_space<vmem>>, %arg6: memref<30x60xf32, #tpu.memory_space<vmem>>, %arg7: memref<30x1xf32, #tpu.memory_space<vmem>>, %arg8: memref<3x30xf32, #tpu.memory_space<vmem>>, %arg9: memref<3x1xf32, #tpu.memory_space<vmem>>, %arg10: memref<3x256xf32, #tpu.memory_space<vmem>>) attributes {dimension_semantics = [#tpu.dimension_semantics<parallel>], iteration_bounds = array<i64: 1>, scalar_prefetch = 0 : i64, scratch_operands = 0 : i64, tpu.core_type = #tpu.core_type<tc>, window_params = [{transform_indices = @transform_0, window_bounds = array<i64: 6, 256>}, {pipeline_mode = #tpu.pipeline_mode<synchronous>, transform_indices = @transform_1, window_bounds = array<i64: 60, 6>}, {pipeline_mode = #tpu.pipeline_mode<synchronous>, transform_indices = @transform_2, window_bounds = array<i64: 60, 1>}, {pipeline_mode = #tpu.pipeline_mode<synchronous>, transform_indices = @transform_3, window_bounds = array<i64: 60, 60>}, {pipeline_mode = #tpu.pipeline_mode<synchronous>, transform_indices = @transform_4, window_bounds = array<i64: 60, 1>}, {pipeline_mode = #tpu.pipeline_mode<synchronous>, transform_indices = @transform_5, window_bounds = array<i64: 30, 60>}, {pipeline_mode = #tpu.pipeline_mode<synchronous>, transform_indices = @transform_6, window_bounds = array<i64: 30, 1>}, {pipeline_mode = #tpu.pipeline_mode<synchronous>, transform_indices = @transform_7, window_bounds = array<i64: 3, 30>}, {pipeline_mode = #tpu.pipeline_mode<synchronous>, transform_indices = @transform_8, window_bounds = array<i64: 3, 1>}, {transform_indices = @transform_9, window_bounds = array<i64: 3, 256>}]} {
    %c0 = arith.constant 0 : index
    %c0_0 = arith.constant 0 : index
    %0 = vector.load %arg2[%c0, %c0_0] : memref<60x6xf32, #tpu.memory_space<vmem>>, vector<60x6xf32>
    %c0_1 = arith.constant 0 : index
    %c0_2 = arith.constant 0 : index
    %1 = vector.load %arg3[%c0_1, %c0_2] : memref<60x1xf32, #tpu.memory_space<vmem>>, vector<60x1xf32>
    %c0_3 = arith.constant 0 : index
    %c0_4 = arith.constant 0 : index
    %2 = vector.load %arg4[%c0_3, %c0_4] : memref<60x60xf32, #tpu.memory_space<vmem>>, vector<60x60xf32>
    %c0_5 = arith.constant 0 : index
    %c0_6 = arith.constant 0 : index
    %3 = vector.load %arg5[%c0_5, %c0_6] : memref<60x1xf32, #tpu.memory_space<vmem>>, vector<60x1xf32>
    %c0_7 = arith.constant 0 : index
    %c0_8 = arith.constant 0 : index
    %4 = vector.load %arg6[%c0_7, %c0_8] : memref<30x60xf32, #tpu.memory_space<vmem>>, vector<30x60xf32>
    %c0_9 = arith.constant 0 : index
    %c0_10 = arith.constant 0 : index
    %5 = vector.load %arg7[%c0_9, %c0_10] : memref<30x1xf32, #tpu.memory_space<vmem>>, vector<30x1xf32>
    %c0_11 = arith.constant 0 : index
    %c0_12 = arith.constant 0 : index
    %6 = vector.load %arg8[%c0_11, %c0_12] : memref<3x30xf32, #tpu.memory_space<vmem>>, vector<3x30xf32>
    %c0_13 = arith.constant 0 : index
    %c0_14 = arith.constant 0 : index
    %7 = vector.load %arg9[%c0_13, %c0_14] : memref<3x1xf32, #tpu.memory_space<vmem>>, vector<3x1xf32>
    %c0_i32 = arith.constant 0 : i32
    %c256_i32 = arith.constant 256 : i32
    %8 = arith.muli %c0_i32, %c256_i32 : i32
    %9 = tpu.assume_multiple %8, 256 : i32
    %c0_15 = arith.constant 0 : index
    %10 = arith.index_cast %9 : i32 to index
    %11 = vector.load %arg1[%c0_15, %10] : memref<6x256xf32, #tpu.memory_space<vmem>>, vector<6x256xf32>
    %cst = arith.constant dense<0.000000e+00> : vector<60x256xf32>
    %12 = tpu.matmul %0, %11, %cst {dimension_numbers = #tpu.dot_dimension_numbers<[1], [0], [0], [1], [0, 0, 1, 1], [], []>} : vector<60x6xf32>, vector<6x256xf32>, vector<60x256xf32> -> vector<60x256xf32>
    %13 = vector.broadcast %1 : vector<60x1xf32> to vector<60x256xf32>
    %14 = arith.addf %12, %13 : vector<60x256xf32>
    %cst_16 = arith.constant 0.000000e+00 : f32
    %15 = vector.broadcast %cst_16 : f32 to vector<60x256xf32>
    %16 = arith.maximumf %14, %15 : vector<60x256xf32>
    %cst_17 = arith.constant dense<0.000000e+00> : vector<60x256xf32>
    %17 = tpu.matmul %2, %16, %cst_17 {dimension_numbers = #tpu.dot_dimension_numbers<[1], [0], [0], [1], [0, 0, 1, 1], [], []>} : vector<60x60xf32>, vector<60x256xf32>, vector<60x256xf32> -> vector<60x256xf32>
    %18 = vector.broadcast %3 : vector<60x1xf32> to vector<60x256xf32>
    %19 = arith.addf %17, %18 : vector<60x256xf32>
    %cst_18 = arith.constant 0.000000e+00 : f32
    %20 = vector.broadcast %cst_18 : f32 to vector<60x256xf32>
    %21 = arith.maximumf %19, %20 : vector<60x256xf32>
    %cst_19 = arith.constant dense<0.000000e+00> : vector<30x256xf32>
    %22 = tpu.matmul %4, %21, %cst_19 {dimension_numbers = #tpu.dot_dimension_numbers<[1], [0], [0], [1], [0, 0, 1, 1], [], []>} : vector<30x60xf32>, vector<60x256xf32>, vector<30x256xf32> -> vector<30x256xf32>
    %23 = vector.broadcast %5 : vector<30x1xf32> to vector<30x256xf32>
    %24 = arith.addf %22, %23 : vector<30x256xf32>
    %cst_20 = arith.constant 0.000000e+00 : f32
    %25 = vector.broadcast %cst_20 : f32 to vector<30x256xf32>
    %26 = arith.maximumf %24, %25 : vector<30x256xf32>
    %cst_21 = arith.constant dense<0.000000e+00> : vector<3x256xf32>
    %27 = tpu.matmul %6, %26, %cst_21 {dimension_numbers = #tpu.dot_dimension_numbers<[1], [0], [0], [1], [0, 0, 1, 1], [], []>} : vector<3x30xf32>, vector<30x256xf32>, vector<3x256xf32> -> vector<3x256xf32>
    %28 = vector.broadcast %7 : vector<3x1xf32> to vector<3x256xf32>
    %29 = arith.addf %27, %28 : vector<3x256xf32>
    %30 = arith.negf %29 : vector<3x256xf32>
    %31 = math.exp %30 : vector<3x256xf32>
    %cst_22 = arith.constant 1.000000e+00 : f32
    %32 = vector.broadcast %cst_22 : f32 to vector<3x256xf32>
    %33 = arith.addf %32, %31 : vector<3x256xf32>
    %34 = arith.divf %32, %33 : vector<3x256xf32>
    %cst_23 = arith.constant 2.000000e+00 : f32
    %35 = vector.broadcast %cst_23 : f32 to vector<3x256xf32>
    %36 = arith.mulf %35, %34 : vector<3x256xf32>
    %c0_24 = arith.constant 0 : index
    %37 = arith.index_cast %9 : i32 to index
    %38 = vector.load %arg10[%c0_24, %37] : memref<3x256xf32, #tpu.memory_space<vmem>>, vector<3x256xf32>
    tpu.vector_store %arg10[%c0_24, %37], %36 {strides = array<i32>} : memref<3x256xf32, #tpu.memory_space<vmem>>, vector<3x256xf32>,
    %c1_i32 = arith.constant 1 : i32
    return
  }
  func.func @transform_0(%arg0: i32) -> (i32, i32) {
    %c0_i32 = arith.constant 0 : i32
    %c0_i32_0 = arith.constant 0 : i32
    return %c0_i32, %arg0 : i32, i32
  }
  func.func @transform_1(%arg0: i32) -> (i32, i32) {
    %c0_i32 = arith.constant 0 : i32
    %c0_i32_0 = arith.constant 0 : i32
    %c0_i32_1 = arith.constant 0 : i32
    return %c0_i32, %c0_i32_0 : i32, i32
  }
  func.func @transform_2(%arg0: i32) -> (i32, i32) {
    %c0_i32 = arith.constant 0 : i32
    %c0_i32_0 = arith.constant 0 : i32
    %c0_i32_1 = arith.constant 0 : i32
    return %c0_i32, %c0_i32_0 : i32, i32
  }
  func.func @transform_3(%arg0: i32) -> (i32, i32) {
    %c0_i32 = arith.constant 0 : i32
    %c0_i32_0 = arith.constant 0 : i32
    %c0_i32_1 = arith.constant 0 : i32
    return %c0_i32, %c0_i32_0 : i32, i32
  }
  func.func @transform_4(%arg0: i32) -> (i32, i32) {
    %c0_i32 = arith.constant 0 : i32
    %c0_i32_0 = arith.constant 0 : i32
    %c0_i32_1 = arith.constant 0 : i32
    return %c0_i32, %c0_i32_0 : i32, i32
  }
  func.func @transform_5(%arg0: i32) -> (i32, i32) {
    %c0_i32 = arith.constant 0 : i32
    %c0_i32_0 = arith.constant 0 : i32
    %c0_i32_1 = arith.constant 0 : i32
    return %c0_i32, %c0_i32_0 : i32, i32
  }
  func.func @transform_6(%arg0: i32) -> (i32, i32) {
    %c0_i32 = arith.constant 0 : i32
    %c0_i32_0 = arith.constant 0 : i32
    %c0_i32_1 = arith.constant 0 : i32
    return %c0_i32, %c0_i32_0 : i32, i32
  }
  func.func @transform_7(%arg0: i32) -> (i32, i32) {
    %c0_i32 = arith.constant 0 : i32
    %c0_i32_0 = arith.constant 0 : i32
    %c0_i32_1 = arith.constant 0 : i32
    return %c0_i32, %c0_i32_0 : i32, i32
  }
  func.func @transform_8(%arg0: i32) -> (i32, i32) {
    %c0_i32 = arith.constant 0 : i32
    %c0_i32_0 = arith.constant 0 : i32
    %c0_i32_1 = arith.constant 0 : i32
    return %c0_i32, %c0_i32_0 : i32, i32
  }
  func.func @transform_9(%arg0: i32) -> (i32, i32) {
    %c0_i32 = arith.constant 0 : i32
    %c0_i32_0 = arith.constant 0 : i32
    return %c0_i32, %arg0 : i32, i32
  }
}

</mosaic_0001>

<bundles_post_ra>
// kernel: neural_net_forward.1
= control target key start
LH: loop header
LB: loop body
LE: loop exit
PB: predicated region body
PF: predicated region fallthrough
CT: control target
= control target key end

     0   :  { %vm141_vm0 = vcmask 1045504   ;;  %v812_v2 = vmov 0.0   ;;  %vm116_vm1 = vcmask 48128   ;;  %v813_v4 = vmov 0   ;;  %s1058_s0 = inlined_call_operand.vmem [shape: f32[6,256], index: 0, kind: input, shape index: {}]   ;;  %s1059_s1 = inlined_call_operand.vmem [shape: f32[60,6], index: 1, kind: input, shape index: {}]   ;;  %s1060_s2 = inlined_call_operand.vmem [shape: f32[60,1], index: 2, kind: input, shape index: {}]   ;;  %s1061_s4 = inlined_call_operand.vmem [shape: f32[60,1], index: 4, kind: input, shape index: {}]   ;;  %s1062_s6 = inlined_call_operand.vmem [shape: f32[30,1], index: 6, kind: input, shape index: {}]   ;;  %s1063_s8 = inlined_call_operand.vmem [shape: f32[3,1], index: 8, kind: input, shape index: {}]   ;;  %s1064_s3 = inlined_call_operand.vmem [shape: f32[60,60], index: 3, kind: input, shape index: {}]   ;;  %s1065_s5 = inlined_call_operand.vmem [shape: f32[30,60], index: 5, kind: input, shape index: {}]   ;;  %s1066_s7 = inlined_call_operand.vmem [shape: f32[3,30], index: 7, kind: input, shape index: {}]   ;;  %s1067_s9 = inlined_call_operand.vmem [shape: f32[3,256], index: 9, kind: output, shape index: {}]  }
   0x1   :  { %v75_v0 = vld [vmem:[%s1058_s0 + $0x8] sm:$0x3f]  ;;  %v74_v1 = vld [vmem:[%s1058_s0] sm:$0x3f]  ;;  %212 = vmatprep.mubr.f32.mxu0 %v812_v2  ;;  %802 = vset.pattern.permute.xlu0 %v813_v4  ;;  %v42_v7 = vld [vmem:[%s1060_s2 + $0x10] sm:$0xff]  ;;  %vm342_vm2 = vcmask 1043456  }
   0x2   :  { %v32_v3 = vld [vmem:[%s1059_s1] sm:$0xff]  ;;  %722 = vmatprep.subr.msk.mxu0 %vm141_vm0, %v75_v0  ;;  %803 = vset.pattern.permute.xlu1 %v813_v4  ;;  %v33_v6 = vld [vmem:[%s1059_s1 + $0x8] sm:$0xff]  ;;  %v43_v9 = vld [vmem:[%s1060_s2 + $0x18] sm:$0xff]  ;;  %vm814_vm3 = vmmov 1   ;;  %vm317_vm5 = vcmask 490496   ;;  %vm618_vm7 = vcmask 244736  }
   0x3   :  { %723 = vmatpush1.msk.msra.mxu0 %vm141_vm0, %v74_v1  ;;  %413 = vmatprep.mubr.f32.mxu1 %v812_v2  ;;  %v40_v5 = vld [vmem:[%s1060_s2] sm:$0xff]  ;;  %v41_v8 = vld [vmem:[%s1060_s2 + $0x8] sm:$0xff]  ;;  %v34_v10 = vld [vmem:[%s1059_s1 + $0x10] sm:$0xff] }
   0x4   :  { %724 = vmatmul.mubr.msk.f32.vlgmr.msra.gmra.mrb[0].mxu0 %vm116_vm1, %v32_v3  ;;  %78 = vperm.xlu0 %802, %v40_v5   ;;  %v44_v11 = vld [vmem:[%s1060_s2 + $0x20] sm:$0xff]  ;;  %v45_v12 = vld [vmem:[%s1060_s2 + $0x28] sm:$0xff]  ;;  %v35_v13 = vld [vmem:[%s1059_s1 + $0x18] sm:$0xff] }
   0x5   :  { %218 = vmatprep.mubr.f32.mxu0 %v812_v2  ;;  %88 = vperm.xlu1 %803, %v42_v7   ;;  %v46_v14 = vld [vmem:[%s1060_s2 + $0x30] sm:$0xff]  ;;  %v47_v15 = vld [vmem:[%s1060_s2 + $0x38] sm:$0xf]  ;;  %v36_v16 = vld [vmem:[%s1059_s1 + $0x20] sm:$0xff] }
   0x6   :  { %v56_v17 = vld [vmem:[%s1061_s4] sm:$0xff]  ;;  %v57_v18 = vld [vmem:[%s1061_s4 + $0x8] sm:$0xff]  ;;  %v58_v20 = vld [vmem:[%s1061_s4 + $0x10] sm:$0xff] }
   0x7   :  { %v37_v19 = vld [vmem:[%s1059_s1 + $0x28] sm:$0xff]  ;;  %v59_v21 = vld [vmem:[%s1061_s4 + $0x18] sm:$0xff]  ;;  %v38_v22 = vld [vmem:[%s1059_s1 + $0x30] sm:$0xff] }
   0x8   :  { %725 = vmatmul.mubr.msk.f32.gmra.mrb[2].mxu0 %vm116_vm1, %v33_v6  ;;  %83 = vperm.xlu0 %802, %v41_v8   ;;  %v60_v23 = vld [vmem:[%s1061_s4 + $0x20] sm:$0xff]  ;;  %v61_v24 = vld [vmem:[%s1061_s4 + $0x28] sm:$0xff]  ;;  %v39_v25 = vld [vmem:[%s1059_s1 + $0x38] sm:$0xf] }
   0x9   :  { %224 = vmatprep.mubr.f32.mxu0 %v812_v2  ;;  %93 = vperm.xlu1 %803, %v43_v9   ;;  %v62_v26 = vld [vmem:[%s1061_s4 + $0x30] sm:$0xff]  ;;  %v63_v27 = vld [vmem:[%s1061_s4 + $0x38] sm:$0xf]  ;;  %v68_v28 = vld [vmem:[%s1062_s6] sm:$0xff] }
   0xa   :  { %v69_v29 = vld [vmem:[%s1062_s6 + $0x8] sm:$0xff]  ;;  %v70_v30 = vld [vmem:[%s1062_s6 + $0x10] sm:$0xff]  ;;  %v71_v31 = vld [vmem:[%s1062_s6 + $0x18] sm:$0x3f] }
   0xb   :  { %v73_v32 = vld [vmem:[%s1063_s8] sm:$0x7]  ;;  %vm979_vm4 = vmpackc.low %vm342_vm2, %vm814_vm3 }
   0xc   :  { %726 = vmatmul.mubr.msk.f32.gmra.mrb[4].mxu0 %vm116_vm1, %v34_v10  ;;  %98 = vperm.xlu0 %802, %v44_v11   ;;  %vm794_vm6 = vmpackc.low %vm141_vm0, %vm814_vm3 }
   0xd   :  { %230 = vmatprep.mubr.f32.mxu0 %v812_v2  ;;  %103 = vperm.xlu1 %803, %v45_v12  }
  0x10   :  { %727 = vmatmul.mubr.msk.f32.gmra.mrb[6].mxu0 %vm116_vm1, %v35_v13  ;;  %108 = vperm.xlu0 %802, %v46_v14  }
  0x11   :  { %236 = vmatprep.mubr.f32.mxu0 %v812_v2  ;;  %113 = vperm.xlu1 %803, %v47_v15  }
  0x14   :  { %728 = vmatmul.mubr.msk.f32.gmra.mrb[8].mxu0 %vm116_vm1, %v36_v16  ;;  %279 = vperm.xlu0 %802, %v56_v17  }
  0x15   :  { %242 = vmatprep.mubr.f32.mxu0 %v812_v2  ;;  %284 = vperm.xlu1 %803, %v57_v18  }
  0x18   :  { %729 = vmatmul.mubr.msk.f32.gmra.mrb[10].mxu0 %vm116_vm1, %v37_v19  ;;  %289 = vperm.xlu0 %802, %v58_v20  }
  0x19   :  { %248 = vmatprep.mubr.f32.mxu0 %v812_v2  ;;  %294 = vperm.xlu1 %803, %v59_v21  }
  0x1c   :  { %730 = vmatmul.mubr.msk.f32.gmra.mrb[12].mxu0 %vm116_vm1, %v38_v22  ;;  %299 = vperm.xlu0 %802, %v60_v23  }
  0x1d   :  { %254 = vmatprep.mubr.f32.mxu0 %v812_v2  ;;  %304 = vperm.xlu1 %803, %v61_v24  }
  0x20   :  { %731 = vmatmul.mubr.msk.f32.gmra.mrb[14].mxu0 %vm116_vm1, %v39_v25  ;;  %309 = vperm.xlu0 %802, %v62_v26  }
  0x21   :  { %580 = vmatprep.mubr.f32.mxu0 %v812_v2  ;;  %314 = vperm.xlu1 %803, %v63_v27  }
  0x24   :  { %480 = vperm.xlu0 %802, %v68_v28  }
  0x25   :  { %485 = vperm.xlu1 %803, %v69_v29  }
  0x28   :  { %490 = vperm.xlu0 %802, %v70_v30  }
  0x29   :  { %495 = vperm.xlu1 %803, %v71_v31  }
  0x2c   :  { %615 = vperm.xlu0 %802, %v73_v32  }
  0x83   :  { %v79_v33 = vpop.permute.xlu0 %78 }
  0x84   :  { %v89_v42 = vpop.permute.xlu1 %88 }
  0x87   :  { %v84_v37 = vpop.permute.xlu0 %83 }
  0x88   :  { %v94_v53 = vpop.permute.xlu1 %93 }
  0x8b   :  { %v99_v3 = vpop.permute.xlu0 %98 }
  0x8c   :  { %v104_v6 = vpop.permute.xlu1 %103 }
  0x8f   :  { %v109_v19 = vpop.permute.xlu0 %108 }
  0x90   :  { %v114_v22 = vpop.permute.xlu1 %113 }
  0xd7   :  { %v214_v34 = vpop.f32.mrb[0].mxu0 }
  0xd8   :  { %v216_v35 = vpop.f32.mrb[1].mxu0  ;;  %v215_v36 = vadd.f32 %v214_v34, %v79_v33 }
  0xd9   :  { %v217_v38 = vadd.f32 %v216_v35, %v79_v33  ;;  %v48_v35 = vld [vmem:[%s1064_s3] sm:$0xff]  ;;  %v66_v33 = vld [vmem:[%s1065_s5 + $0x10] sm:$0xff] }
  0xda   :  { %v261_v44 = vmax.f32 %v215_v36, 0.0  ;;  %v49_v36 = vld [vmem:[%s1064_s3 + $0x8] sm:$0xff] }
  0xdb   :  { %v220_v39 = vpop.f32.mrb[2].mxu0  ;;  %v262_v46 = vmax.f32 %v217_v38, 0.0  ;;  %v51_v38 = vld [vmem:[%s1064_s3 + $0x18] sm:$0xff] }
  0xdc   :  { %v221_v40 = vadd.f32 %v220_v39, %v84_v37  ;;  %v222_v41 = vpop.f32.mrb[3].mxu0  ;;  %v52_v39 = vld [vmem:[%s1064_s3 + $0x20] sm:$0xff] }
  0xdd   :  { %v223_v43 = vadd.f32 %v222_v41, %v84_v37  ;;  %v50_v37 = vld [vmem:[%s1064_s3 + $0x10] sm:$0xff] }
  0xde   :  { %v263_v45 = vmax.f32 %v221_v40, 0.0  ;;  %v53_v40 = vld [vmem:[%s1064_s3 + $0x28] sm:$0xff]  ;;  %v54_v41 = vld [vmem:[%s1064_s3 + $0x30] sm:$0xff] }
  0xdf   :  { %v264_v47 = vmax.f32 %v223_v43, 0.0  ;;  %v226_v48 = vpop.f32.mrb[4].mxu0 }
  0xe0   :  { %v228_v49 = vpop.f32.mrb[5].mxu0  ;;  %v755_v50 = vpack.c.bf16 %v263_v45, %v261_v44  ;;  %v227_v52 = vadd.f32 %v226_v48, %v89_v42  ;;  %v280_v45 = vpop.permute.xlu0 %279 }
  0xe1   :  { %v753_v51 = vpack.c.bf16 %v264_v47, %v262_v46  ;;  %v229_v54 = vadd.f32 %v228_v49, %v89_v42  ;;  %v55_v42 = vld [vmem:[%s1064_s3 + $0x38] sm:$0xf]  ;;  %v285_v47 = vpop.permute.xlu1 %284 }
  0xe2   :  { %v265_v59 = vmax.f32 %v227_v52, 0.0 }
  0xe3   :  { %v232_v55 = vpop.f32.mrb[6].mxu0  ;;  %754 = vmatprep.subr.bf16.mxu1 %v753_v51  ;;  %v266_v61 = vmax.f32 %v229_v54, 0.0 }
  0xe4   :  { %v233_v56 = vadd.f32 %v232_v55, %v94_v53  ;;  %v234_v57 = vpop.f32.mrb[7].mxu0  ;;  %756 = vmatpush1.bf16.msra.mxu1 %v755_v50 }
  0xe5   :  { %v235_v58 = vadd.f32 %v234_v57, %v94_v53 }
  0xe6   :  { %v267_v60 = vmax.f32 %v233_v56, 0.0 }
  0xe7   :  { %v268_v62 = vmax.f32 %v235_v58, 0.0  ;;  %v238_v63 = vpop.f32.mrb[8].mxu0 }
  0xe8   :  { %v759_v0 = vpack.c.bf16 %v267_v60, %v265_v59  ;;  %v240_v1 = vpop.f32.mrb[9].mxu0  ;;  %v239_v5 = vadd.f32 %v238_v63, %v99_v3  ;;  %v290_v60 = vpop.permute.xlu0 %289 }
  0xe9   :  { %v757_v4 = vpack.c.bf16 %v268_v62, %v266_v61  ;;  %v241_v7 = vadd.f32 %v240_v1, %v99_v3  ;;  %v295_v63 = vpop.permute.xlu1 %294 }
  0xea   :  { %v269_v12 = vmax.f32 %v239_v5, 0.0 }
  0xeb   :  { %v244_v8 = vpop.f32.mrb[10].mxu0  ;;  %758 = vmatprep.subr.bf16.mxu1 %v757_v4  ;;  %v270_v14 = vmax.f32 %v241_v7, 0.0 }
  0xec   :  { %v245_v9 = vadd.f32 %v244_v8, %v104_v6  ;;  %v246_v10 = vpop.f32.mrb[11].mxu0  ;;  %760 = vmatpush1.bf16.msra.mxu1 %v759_v0 }
  0xed   :  { %v247_v11 = vadd.f32 %v246_v10, %v104_v6 }
  0xee   :  { %v271_v13 = vmax.f32 %v245_v9, 0.0 }
  0xef   :  { %v272_v15 = vmax.f32 %v247_v11, 0.0  ;;  %v250_v16 = vpop.f32.mrb[12].mxu0 }
  0xf0   :  { %v763_v17 = vpack.c.bf16 %v271_v13, %v269_v12  ;;  %v252_v18 = vpop.f32.mrb[13].mxu0  ;;  %v251_v21 = vadd.f32 %v250_v16, %v109_v19  ;;  %v300_v13 = vpop.permute.xlu0 %299 }
  0xf1   :  { %v761_v20 = vpack.c.bf16 %v272_v15, %v270_v14  ;;  %v253_v23 = vadd.f32 %v252_v18, %v109_v19  ;;  %v305_v16 = vpop.permute.xlu1 %304 }
  0xf2   :  { %v273_v28 = vmax.f32 %v251_v21, 0.0 }
  0xf3   :  { %v256_v24 = vpop.f32.mrb[14].mxu0  ;;  %762 = vmatprep.subr.bf16.mxu1 %v761_v20  ;;  %v274_v30 = vmax.f32 %v253_v23, 0.0 }
  0xf4   :  { %v257_v25 = vadd.f32 %v256_v24, %v114_v22  ;;  %v258_v26 = vpop.f32.mrb[15].mxu0  ;;  %764 = vmatpush1.bf16.msra.mxu1 %v763_v17 }
  0xf5   :  { %v259_v27 = vadd.f32 %v258_v26, %v114_v22 }
  0xf6   :  { %v275_v29 = vmax.f32 %v257_v25, 0.0 }
  0xf7   :  { %v276_v31 = vmax.f32 %v259_v27, 0.0 }
  0xf8   :  { %v768_v32 = vpack.c.bf16 %v275_v29, %v273_v28  ;;  %v310_v29 = vpop.permute.xlu0 %309 }
  0xf9   :  { %v765_v34 = vpack.c.bf16 %v276_v31, %v274_v30 }
  0xfb   :  { %767 = vmatprep.subr.msk.bf16.mxu1 %vm979_vm4, %v765_v34 }
  0xfc   :  { %770 = vmatpush1.bf16.msk.msra.mxu1 %vm979_vm4, %v768_v32  ;;  %v315_v32 = vpop.permute.xlu1 %314 }
  0xff   :  { %734 = vmatmul.mubr.msk.f32.vlgmr.msra.gmra.mrb[0].mxu1 %vm317_vm5, %v48_v35 }
 0x100   :  { %419 = vmatprep.mubr.f32.mxu1 %v812_v2 }
 0x103   :  { %735 = vmatmul.mubr.msk.f32.gmra.mrb[2].mxu1 %vm317_vm5, %v49_v36 }
 0x104   :  { %425 = vmatprep.mubr.f32.mxu1 %v812_v2 }
 0x107   :  { %736 = vmatmul.mubr.msk.f32.gmra.mrb[4].mxu1 %vm317_vm5, %v50_v37 }
 0x108   :  { %431 = vmatprep.mubr.f32.mxu1 %v812_v2 }
 0x10b   :  { %737 = vmatmul.mubr.msk.f32.gmra.mrb[6].mxu1 %vm317_vm5, %v51_v38 }
 0x10c   :  { %437 = vmatprep.mubr.f32.mxu1 %v812_v2 }
 0x10f   :  { %738 = vmatmul.mubr.msk.f32.gmra.mrb[8].mxu1 %vm317_vm5, %v52_v39 }
 0x110   :  { %443 = vmatprep.mubr.f32.mxu1 %v812_v2 }
 0x113   :  { %739 = vmatmul.mubr.msk.f32.gmra.mrb[10].mxu1 %vm317_vm5, %v53_v40 }
 0x114   :  { %449 = vmatprep.mubr.f32.mxu1 %v812_v2 }
 0x117   :  { %740 = vmatmul.mubr.msk.f32.gmra.mrb[12].mxu1 %vm317_vm5, %v54_v41 }
 0x118   :  { %455 = vmatprep.mubr.f32.mxu1 %v812_v2 }
 0x11b   :  { %741 = vmatmul.mubr.msk.f32.gmra.mrb[14].mxu1 %vm317_vm5, %v55_v42 }
 0x11c   :  { %692 = vmatprep.mubr.f32.mxu1 %v812_v2 }
 0x1d2   :  { %v415_v43 = vpop.f32.mrb[0].mxu1 }
 0x1d3   :  { %v417_v44 = vpop.f32.mrb[1].mxu1  ;;  %v416_v46 = vadd.f32 %v415_v43, %v280_v45 }
 0x1d4   :  { %v418_v48 = vadd.f32 %v417_v44, %v280_v45  ;;  %v64_v45 = vld [vmem:[%s1065_s5] sm:$0xff] }
 0x1d5   :  { %v462_v53 = vmax.f32 %v416_v46, 0.0  ;;  %v65_v46 = vld [vmem:[%s1065_s5 + $0x8] sm:$0xff] }
 0x1d6   :  { %v421_v49 = vpop.f32.mrb[2].mxu1  ;;  %v463_v55 = vmax.f32 %v418_v48, 0.0 }
 0x1d7   :  { %v422_v50 = vadd.f32 %v421_v49, %v285_v47  ;;  %v423_v51 = vpop.f32.mrb[3].mxu1 }
 0x1d8   :  { %v424_v52 = vadd.f32 %v423_v51, %v285_v47  ;;  %v67_v47 = vld [vmem:[%s1065_s5 + $0x18] sm:$0x3f] }
 0x1d9   :  { %v464_v54 = vmax.f32 %v422_v50, 0.0  ;;  %v481_v50 = vpop.permute.xlu0 %480 }
 0x1da   :  { %v465_v56 = vmax.f32 %v424_v52, 0.0  ;;  %v427_v57 = vpop.f32.mrb[4].mxu1  ;;  %v486_v52 = vpop.permute.xlu1 %485 }
 0x1db   :  { %v773_v58 = vpack.c.bf16 %v464_v54, %v462_v53  ;;  %v429_v59 = vpop.f32.mrb[5].mxu1  ;;  %v428_v62 = vadd.f32 %v427_v57, %v290_v60 }
 0x1dc   :  { %v771_v61 = vpack.c.bf16 %v465_v56, %v463_v55  ;;  %v430_v0 = vadd.f32 %v429_v59, %v290_v60 }
 0x1dd   :  { %v466_v6 = vmax.f32 %v428_v62, 0.0 }
 0x1de   :  { %v433_v1 = vpop.f32.mrb[6].mxu1  ;;  %772 = vmatprep.subr.bf16.mxu0 %v771_v61  ;;  %v467_v8 = vmax.f32 %v430_v0, 0.0  ;;  %v491_v0 = vpop.permute.xlu0 %490 }
 0x1df   :  { %v434_v3 = vadd.f32 %v433_v1, %v295_v63  ;;  %v435_v4 = vpop.f32.mrb[7].mxu1  ;;  %774 = vmatpush1.bf16.msra.mxu0 %v773_v58 }
 0x1e0   :  { %v436_v5 = vadd.f32 %v435_v4, %v295_v63  ;;  %v496_v4 = vpop.permute.xlu1 %495 }
 0x1e1   :  { %v468_v7 = vmax.f32 %v434_v3, 0.0 }
 0x1e2   :  { %v469_v9 = vmax.f32 %v436_v5, 0.0  ;;  %v439_v10 = vpop.f32.mrb[8].mxu1 }
 0x1e3   :  { %v777_v11 = vpack.c.bf16 %v468_v7, %v466_v6  ;;  %v441_v12 = vpop.f32.mrb[9].mxu1  ;;  %v440_v15 = vadd.f32 %v439_v10, %v300_v13 }
 0x1e4   :  { %v775_v14 = vpack.c.bf16 %v469_v9, %v467_v8  ;;  %v442_v17 = vadd.f32 %v441_v12, %v300_v13 }
 0x1e5   :  { %v470_v22 = vmax.f32 %v440_v15, 0.0 }
 0x1e6   :  { %v445_v18 = vpop.f32.mrb[10].mxu1  ;;  %776 = vmatprep.subr.bf16.mxu0 %v775_v14  ;;  %v471_v24 = vmax.f32 %v442_v17, 0.0  ;;  %v616_v17 = vpop.permute.xlu0 %615 }
 0x1e7   :  { %v446_v19 = vadd.f32 %v445_v18, %v305_v16  ;;  %v447_v20 = vpop.f32.mrb[11].mxu1  ;;  %778 = vmatpush1.bf16.msra.mxu0 %v777_v11 }
 0x1e8   :  { %v448_v21 = vadd.f32 %v447_v20, %v305_v16  ;;  %v72_v16 = vld [vmem:[%s1066_s7] sm:$0x7] }
 0x1e9   :  { %v472_v23 = vmax.f32 %v446_v19, 0.0 }
 0x1ea   :  { %v473_v25 = vmax.f32 %v448_v21, 0.0  ;;  %v451_v26 = vpop.f32.mrb[12].mxu1 }
 0x1eb   :  { %v781_v27 = vpack.c.bf16 %v472_v23, %v470_v22  ;;  %v453_v28 = vpop.f32.mrb[13].mxu1  ;;  %v452_v31 = vadd.f32 %v451_v26, %v310_v29 }
 0x1ec   :  { %v779_v30 = vpack.c.bf16 %v473_v25, %v471_v24  ;;  %v454_v34 = vadd.f32 %v453_v28, %v310_v29 }
 0x1ed   :  { %v474_v39 = vmax.f32 %v452_v31, 0.0 }
 0x1ee   :  { %v457_v35 = vpop.f32.mrb[14].mxu1  ;;  %780 = vmatprep.subr.bf16.mxu0 %v779_v30  ;;  %v475_v41 = vmax.f32 %v454_v34, 0.0 }
 0x1ef   :  { %v458_v36 = vadd.f32 %v457_v35, %v315_v32  ;;  %v459_v37 = vpop.f32.mrb[15].mxu1  ;;  %782 = vmatpush1.bf16.msra.mxu0 %v781_v27 }
 0x1f0   :  { %v460_v38 = vadd.f32 %v459_v37, %v315_v32 }
 0x1f1   :  { %v476_v40 = vmax.f32 %v458_v36, 0.0 }
 0x1f2   :  { %v477_v42 = vmax.f32 %v460_v38, 0.0 }
 0x1f3   :  { %v786_v43 = vpack.c.bf16 %v476_v40, %v474_v39 }
 0x1f4   :  { %v783_v44 = vpack.c.bf16 %v477_v42, %v475_v41 }
 0x1f6   :  { %785 = vmatprep.subr.msk.bf16.mxu0 %vm979_vm4, %v783_v44 }
 0x1f7   :  { %788 = vmatpush1.bf16.msk.msra.mxu0 %vm979_vm4, %v786_v43 }
 0x1fa   :  { %744 = vmatmul.mubr.msk.f32.vlgmr.msra.gmra.mrb[16].mxu0 %vm317_vm5, %v64_v45 }
 0x1fb   :  { %586 = vmatprep.mubr.f32.mxu0 %v812_v2 }
 0x1fe   :  { %745 = vmatmul.mubr.msk.f32.gmra.mrb[18].mxu0 %vm317_vm5, %v65_v46 }
 0x1ff   :  { %592 = vmatprep.mubr.f32.mxu0 %v812_v2 }
 0x202   :  { %746 = vmatmul.mubr.msk.f32.gmra.mrb[20].mxu0 %vm317_vm5, %v66_v33 }
 0x203   :  { %598 = vmatprep.mubr.f32.mxu0 %v812_v2 }
 0x206   :  { %747 = vmatmul.mubr.msk.f32.gmra.mrb[22].mxu0 %vm317_vm5, %v67_v47 }
 0x2cd   :  { %v582_v48 = vpop.f32.mrb[16].mxu0 }
 0x2ce   :  { %v584_v49 = vpop.f32.mrb[17].mxu0  ;;  %v583_v51 = vadd.f32 %v582_v48, %v481_v50 }
 0x2cf   :  { %v585_v53 = vadd.f32 %v584_v49, %v481_v50 }
 0x2d0   :  { %v605_v58 = vmax.f32 %v583_v51, 0.0 }
 0x2d1   :  { %v588_v54 = vpop.f32.mrb[18].mxu0  ;;  %v606_v60 = vmax.f32 %v585_v53, 0.0 }
 0x2d2   :  { %v589_v55 = vadd.f32 %v588_v54, %v486_v52  ;;  %v590_v56 = vpop.f32.mrb[19].mxu0 }
 0x2d3   :  { %v591_v57 = vadd.f32 %v590_v56, %v486_v52 }
 0x2d4   :  { %v607_v59 = vmax.f32 %v589_v55, 0.0 }
 0x2d5   :  { %v608_v2 = vmax.f32 %v591_v57, 0.0  ;;  %v594_v61 = vpop.f32.mrb[20].mxu0 }
 0x2d6   :  { %v791_v62 = vpack.c.bf16 %v607_v59, %v605_v58  ;;  %v596_v63 = vpop.f32.mrb[21].mxu0  ;;  %v595_v3 = vadd.f32 %v594_v61, %v491_v0 }
 0x2d7   :  { %v789_v1 = vpack.c.bf16 %v608_v2, %v606_v60  ;;  %v597_v5 = vadd.f32 %v596_v63, %v491_v0 }
 0x2d8   :  { %v609_v10 = vmax.f32 %v595_v3, 0.0 }
 0x2d9   :  { %v600_v6 = vpop.f32.mrb[22].mxu0  ;;  %790 = vmatprep.subr.bf16.mxu1 %v789_v1  ;;  %v610_v12 = vmax.f32 %v597_v5, 0.0 }
 0x2da   :  { %v601_v7 = vadd.f32 %v600_v6, %v496_v4  ;;  %v602_v8 = vpop.f32.mrb[23].mxu0  ;;  %792 = vmatpush1.bf16.msra.mxu1 %v791_v62 }
 0x2db   :  { %v603_v9 = vadd.f32 %v602_v8, %v496_v4 }
 0x2dc   :  { %v611_v11 = vmax.f32 %v601_v7, 0.0 }
 0x2dd   :  { %v612_v13 = vmax.f32 %v603_v9, 0.0 }
 0x2de   :  { %v796_v14 = vpack.c.bf16 %v611_v11, %v609_v10 }
 0x2df   :  { %v793_v15 = vpack.c.bf16 %v612_v13, %v610_v12 }
 0x2e1   :  { %795 = vmatprep.subr.msk.bf16.mxu1 %vm794_vm6, %v793_v15 }
 0x2e2   :  { %798 = vmatpush1.bf16.msk.msra.mxu1 %vm794_vm6, %v796_v14 }
 0x2e5   :  { %750 = vmatmul.mubr.msk.f32.vlgmr.msra.gmra.mrb[16].mxu1 %vm618_vm7, %v72_v16 }
 0x3b8   :  { %v694_v18 = vpop.f32.mrb[16].mxu1 }
 0x3b9   :  { %v695_v19 = vadd.f32 %v694_v18, %v616_v17  ;;  %v696_v20 = vpop.f32.mrb[17].mxu1 }
 0x3ba   :  { %v697_v21 = vadd.f32 %v696_v20, %v616_v17 }
 0x3bb   :  { %v751_v22 = vmul.f32 -1.442695, %v695_v19 }
 0x3bc   :  { %v752_v23 = vmul.f32 -1.442695, %v697_v21 }
 0x3bd   :  { %804 = vpow2.f32 %v751_v22 }
 0x3be   :  { %806 = vpow2.f32 %v752_v23 }
 0x3c7   :  { %v805_v24 = vpop.eup %804 }
 0x3c8   :  { %v807_v25 = vpop.eup %806  ;;  %v705_v26 = vadd.f32 1.0, %v805_v24 }
 0x3c9   :  { %v706_v27 = vadd.f32 1.0, %v807_v25 }
 0x3ca   :  { %808 = vrcp.f32 %v705_v26 }
 0x3cb   :  { %810 = vrcp.f32 %v706_v27 }
 0x3d4   :  { %v809_v28 = vpop.eup %808 }
 0x3d5   :  { %v811_v29 = vpop.eup %810  ;;  %v711_v30 = vmul.f32 2.0, %v809_v28 }
 0x3d6   :  { %v712_v31 = vmul.f32 2.0, %v811_v29 }
 0x3d8   :  { %v715_v32 = vcombine.low %v711_v30, %v712_v31 }
 0x3da   :  { %717 = vst [vmem:[%s1067_s9] sm:$0x77] %v715_v32 }

</bundles_post_ra>
